<compile_context>
chip_gen: v7x
topology: tpu7x:2x2x1
jax: 0.10.0
libtpu: 0.0.40
codegen_flags: <defaults>
</compile_context>

<pallas_src>
import jax
import jax.numpy as jnp
from jax.experimental import pallas as pl
from jax.experimental.pallas import tpu as pltpu

# --- fixed sizes implied by the module (fc expects 16 * 14 * 14 features) ---
H = W = 28                     # input spatial size
CIN = 3                        # in_channels
COUT = 16                      # conv out_channels
KH = KW = 3                    # conv kernel
PH, PW = H // 2, W // 2        # 14, 14 after 2x2 max pool
PHP = 16                       # pooled-row dim padded to a sublane multiple
NTAP = KH * KW * CIN           # 27 conv taps
NUM_CLASSES = 10
BATCH = 2

# packed sizes used by the fused kernel
ROWS = 4 * PHP                 # 64  rows    ordered (dy, dx, ph_pad)
KBIG = PW * NTAP               # 378 K dim   ordered (pw, tap)
NBIG = PW * COUT               # 224 lanes   ordered (pw, c)
FCN = PH * NUM_CLASSES         # 140 fc cols ordered (ph, n)


def fused_cnn_kernel(patch_ref, wbig_ref, bbig_ref, wstk_ref, mask_ref, fold_ref,
                     fcb_ref, out_ref):
    """Whole SimpleCNN forward for one batch element.

    patch_ref: (1, ROWS, KBIG) im2col patches; row = (dy*2+dx)*PHP + ph,
                               col = pw*NTAP + tap,
                               value = x_pad[2*ph+dy + kh, 2*pw+dx + kw, cin]
                               (rows with ph >= PH are zero padding)
    wbig_ref : (KBIG, NBIG)    kron(I_PW, W_tapxcout)  (block-diag conv weight)
    bbig_ref : (1, NBIG)       conv bias tiled over pw
    wstk_ref : (NBIG, FCN)     fc weight, rows (pw, c), cols (ph, n)
    mask_ref : (PHP, FCN)      1.0 where col block ph' == row ph (and ph < PH)
    fold_ref : (FCN, NUM_CLASSES)  fold matrix: fold[ph*NC + n, n] = 1
    fcb_ref  : (1, NUM_CLASSES)
    out_ref  : (1, 1, NUM_CLASSES) logits
    """
    # Conv 3x3 (zero padding already folded into the im2col) as one MXU matmul.
    conv = jnp.dot(patch_ref[0], wbig_ref[...],
                   preferred_element_type=jnp.float32)          # (ROWS, NBIG)
    conv = jnp.maximum(conv + bbig_ref[...], 0.0)               # bias + ReLU

    # 2x2 max pool, stride 2: rows come in four contiguous PHP-row blocks
    # (one per (dy, dx) of the pooling window) at sublane-aligned offsets
    # -> three VPU maxes on aligned slices.
    pooled = jnp.maximum(
        jnp.maximum(conv[0 * PHP:1 * PHP, :], conv[1 * PHP:2 * PHP, :]),
        jnp.maximum(conv[2 * PHP:3 * PHP, :], conv[3 * PHP:4 * PHP, :]))  # (PHP, NBIG)

    # Fully connected layer: contract the lane dim (pw, c) with the re-laid-out
    # fc weight, then keep only the matching-ph diagonal (1, NUM_CLASSES) blocks
    # via a precomputed mask, a sublane reduce and one tiny fold matmul.
    m = jnp.dot(pooled, wstk_ref[...],
                preferred_element_type=jnp.float32)             # (PHP, FCN)
    summed = jnp.sum(m * mask_ref[...], axis=0, keepdims=True)  # (1, FCN)
    logits = jnp.dot(summed, fold_ref[...],
                     preferred_element_type=jnp.float32) + fcb_ref[...]  # (1, NC)
    out_ref[0] = logits.astype(out_ref.dtype)


def simple_cnn_forward(x_nchw, conv_w, conv_b, fc_w, fc_b):
    """x_nchw: (B, CIN, 28, 28); conv_w: (COUT, CIN, 3, 3); conv_b: (COUT,)
       fc_w: (NUM_CLASSES, COUT*14*14); fc_b: (NUM_CLASSES,)"""
    B = x_nchw.shape[0]
    f32 = jnp.float32

    # ---- activation prep (im2col built once by XLA; conv padding folded in) ----
    x = jnp.transpose(x_nchw, (0, 2, 3, 1)).astype(f32)                  # NHWC
    xp = jnp.pad(x, ((0, 0), (1, 1), (1, 1), (0, 0)))                    # (B,30,30,CIN)
    taps = [xp[:, kh:kh + H, kw:kw + W, :] for kh in range(KH) for kw in range(KW)]
    col = jnp.stack(taps, axis=3).reshape(B, H, W, NTAP)   # tap = (kh*KW+kw)*CIN+cin
    col = col.reshape(B, PH, 2, PW, 2, NTAP)                # h -> (ph, dy), w -> (pw, dx)
    col = jnp.transpose(col, (0, 2, 4, 1, 3, 5))             # (B, dy, dx, ph, pw, tap)
    col = jnp.pad(col, ((0, 0), (0, 0), (0, 0), (0, PHP - PH), (0, 0), (0, 0)))
    patch = col.reshape(B, ROWS, KBIG)

    # ---- weight prep (tiny, constant-foldable re-layouts) ----
    w27 = jnp.transpose(conv_w, (2, 3, 1, 0)).reshape(NTAP, COUT).astype(f32)
    wbig = jnp.kron(jnp.eye(PW, dtype=f32), w27)                         # (KBIG, NBIG)
    bbig = jnp.tile(conv_b.astype(f32), PW).reshape(1, NBIG)
    # fc_w[n, c*PH*PW + ph*PW + pw]  ->  wstk[pw*COUT + c, ph*NUM_CLASSES + n]
    fc4 = fc_w.astype(f32).reshape(NUM_CLASSES, COUT, PH, PW)
    wstk = jnp.transpose(fc4, (3, 1, 2, 0)).reshape(NBIG, FCN)
    fcb = fc_b.astype(f32).reshape(1, NUM_CLASSES)

    # diagonal-block selection mask and lane-fold matrix for the fc tail
    ph_idx = jnp.arange(PHP, dtype=jnp.int32)[:, None]                   # (PHP, 1)
    col_blk = jnp.arange(FCN, dtype=jnp.int32)[None, :] // NUM_CLASSES   # (1, FCN)
    diag_mask = ((ph_idx == col_blk) & (ph_idx < PH)).astype(f32)        # (PHP, FCN)
    fold = (jnp.arange(FCN, dtype=jnp.int32)[:, None] % NUM_CLASSES
            == jnp.arange(NUM_CLASSES, dtype=jnp.int32)[None, :]).astype(f32)

    logits3 = pl.pallas_call(
        fused_cnn_kernel,
        out_shape=jax.ShapeDtypeStruct((B, 1, NUM_CLASSES), f32),
        grid=(B,),
        in_specs=[
            pl.BlockSpec((1, ROWS, KBIG), lambda b: (b, 0, 0)),
            pl.BlockSpec((KBIG, NBIG), lambda b: (0, 0)),
            pl.BlockSpec((1, NBIG), lambda b: (0, 0)),
            pl.BlockSpec((NBIG, FCN), lambda b: (0, 0)),
            pl.BlockSpec((PHP, FCN), lambda b: (0, 0)),
            pl.BlockSpec((FCN, NUM_CLASSES), lambda b: (0, 0)),
            pl.BlockSpec((1, NUM_CLASSES), lambda b: (0, 0)),
        ],
        out_specs=pl.BlockSpec((1, 1, NUM_CLASSES), lambda b: (b, 0, 0)),
        compiler_params=pltpu.CompilerParams(
            dimension_semantics=("parallel",)),   # both v7x TensorCores get a batch elem
    )(patch, wbig, bbig, wstk, diag_mask, fold, fcb)
    return logits3.reshape(B, NUM_CLASSES)


def reference_forward(x_nchw, conv_w, conv_b, fc_w, fc_b):
    """Pure-JAX reference matching the PyTorch forward exactly (sanity check)."""
    B = x_nchw.shape[0]
    y = jax.lax.conv_general_dilated(
        x_nchw, conv_w, window_strides=(1, 1), padding=((1, 1), (1, 1)),
        dimension_numbers=("NCHW", "OIHW", "NCHW"))
    y = y + conv_b[None, :, None, None]
    y = jnp.maximum(y, 0.0)
    y = y.reshape(B, COUT, PH, 2, PW, 2).max(axis=(3, 5))
    flat = y.reshape(B, -1)
    return flat @ fc_w.T + fc_b


if __name__ == "__main__":
    key = jax.random.PRNGKey(0)
    kx, kw1, kb1, kw2, kb2 = jax.random.split(key, 5)

    # Deterministic, PyTorch-style uniform(+-1/sqrt(fan_in)) init.
    x = jax.random.normal(kx, (BATCH, CIN, H, W), jnp.float32)
    conv_bound = 1.0 / (CIN * KH * KW) ** 0.5
    conv_w = jax.random.uniform(kw1, (COUT, CIN, KH, KW), jnp.float32,
                                -conv_bound, conv_bound)
    conv_b = jax.random.uniform(kb1, (COUT,), jnp.float32, -conv_bound, conv_bound)
    fc_in = COUT * PH * PW
    fc_bound = 1.0 / fc_in ** 0.5
    fc_w = jax.random.uniform(kw2, (NUM_CLASSES, fc_in), jnp.float32,
                              -fc_bound, fc_bound)
    fc_b = jax.random.uniform(kb2, (NUM_CLASSES,), jnp.float32, -fc_bound, fc_bound)

    out = simple_cnn_forward(x, conv_w, conv_b, fc_w, fc_b)
    out = jax.block_until_ready(out)

    ref = reference_forward(x, conv_w, conv_b, fc_w, fc_b)
    assert out.shape == (BATCH, NUM_CLASSES), out.shape
    assert jnp.all(jnp.isfinite(out))
    assert jnp.allclose(out, ref, atol=5e-2, rtol=5e-2), (
        "mismatch vs reference: max abs diff = %s" % jnp.max(jnp.abs(out - ref)))

    print("KERNEL_OK")
</pallas_src>

<mosaic_0001>
module attributes {stable_mosaic.version = 11 : i64} {
  func.func @fused_cnn_kernel(%arg0: i32, %arg1: memref<1x64x378xf32, #tpu.memory_space<vmem>>, %arg2: memref<378x224xf32, #tpu.memory_space<vmem>>, %arg3: memref<1x224xf32, #tpu.memory_space<vmem>>, %arg4: memref<224x140xf32, #tpu.memory_space<vmem>>, %arg5: memref<16x140xf32, #tpu.memory_space<vmem>>, %arg6: memref<140x10xf32, #tpu.memory_space<vmem>>, %arg7: memref<1x10xf32, #tpu.memory_space<vmem>>, %arg8: memref<1x1x10xf32, #tpu.memory_space<vmem>>) attributes {dimension_semantics = [#tpu.dimension_semantics<parallel>], iteration_bounds = array<i64: 2>, scalar_prefetch = 0 : i64, scratch_operands = 0 : i64, tpu.core_type = #tpu.core_type<tc>, window_params = [{transform_indices = @transform_0, window_bounds = array<i64: 1, 64, 378>}, {pipeline_mode = #tpu.pipeline_mode<synchronous>, transform_indices = @transform_1, window_bounds = array<i64: 378, 224>}, {pipeline_mode = #tpu.pipeline_mode<synchronous>, transform_indices = @transform_2, window_bounds = array<i64: 1, 224>}, {pipeline_mode = #tpu.pipeline_mode<synchronous>, transform_indices = @transform_3, window_bounds = array<i64: 224, 140>}, {pipeline_mode = #tpu.pipeline_mode<synchronous>, transform_indices = @transform_4, window_bounds = array<i64: 16, 140>}, {pipeline_mode = #tpu.pipeline_mode<synchronous>, transform_indices = @transform_5, window_bounds = array<i64: 140, 10>}, {pipeline_mode = #tpu.pipeline_mode<synchronous>, transform_indices = @transform_6, window_bounds = array<i64: 1, 10>}, {transform_indices = @transform_7, window_bounds = array<i64: 1, 1, 10>}]} {
    %c0 = arith.constant 0 : index
    %c0_0 = arith.constant 0 : index
    %c0_1 = arith.constant 0 : index
    %0 = vector.load %arg1[%c0, %c0_0, %c0_1] : memref<1x64x378xf32, #tpu.memory_space<vmem>>, vector<1x64x378xf32>
    %1 = vector.shape_cast %0 : vector<1x64x378xf32> to vector<64x378xf32>
    %c0_2 = arith.constant 0 : index
    %c0_3 = arith.constant 0 : index
    %2 = vector.load %arg2[%c0_2, %c0_3] : memref<378x224xf32, #tpu.memory_space<vmem>>, vector<378x224xf32>
    %cst = arith.constant dense<0.000000e+00> : vector<64x224xf32>
    %3 = tpu.matmul %1, %2, %cst {dimension_numbers = #tpu.dot_dimension_numbers<[1], [0], [0], [1], [0, 0, 1, 1], [], []>} : vector<64x378xf32>, vector<378x224xf32>, vector<64x224xf32> -> vector<64x224xf32>
    %c0_4 = arith.constant 0 : index
    %c0_5 = arith.constant 0 : index
    %4 = vector.load %arg3[%c0_4, %c0_5] : memref<1x224xf32, #tpu.memory_space<vmem>>, vector<1x224xf32>
    %5 = vector.broadcast %4 : vector<1x224xf32> to vector<64x224xf32>
    %6 = arith.addf %3, %5 : vector<64x224xf32>
    %cst_6 = arith.constant 0.000000e+00 : f32
    %7 = vector.broadcast %cst_6 : f32 to vector<64x224xf32>
    %8 = arith.maximumf %6, %7 : vector<64x224xf32>
    %9 = vector.extract_strided_slice %8 {offsets = [0, 0], sizes = [16, 224], strides = [1, 1]} : vector<64x224xf32> to vector<16x224xf32>
    %10 = vector.extract_strided_slice %8 {offsets = [16, 0], sizes = [16, 224], strides = [1, 1]} : vector<64x224xf32> to vector<16x224xf32>
    %11 = arith.maximumf %9, %10 : vector<16x224xf32>
    %12 = vector.extract_strided_slice %8 {offsets = [32, 0], sizes = [16, 224], strides = [1, 1]} : vector<64x224xf32> to vector<16x224xf32>
    %13 = vector.extract_strided_slice %8 {offsets = [48, 0], sizes = [16, 224], strides = [1, 1]} : vector<64x224xf32> to vector<16x224xf32>
    %14 = arith.maximumf %12, %13 : vector<16x224xf32>
    %15 = arith.maximumf %11, %14 : vector<16x224xf32>
    %c0_7 = arith.constant 0 : index
    %c0_8 = arith.constant 0 : index
    %16 = vector.load %arg4[%c0_7, %c0_8] : memref<224x140xf32, #tpu.memory_space<vmem>>, vector<224x140xf32>
    %cst_9 = arith.constant dense<0.000000e+00> : vector<16x140xf32>
    %17 = tpu.matmul %15, %16, %cst_9 {dimension_numbers = #tpu.dot_dimension_numbers<[1], [0], [0], [1], [0, 0, 1, 1], [], []>} : vector<16x224xf32>, vector<224x140xf32>, vector<16x140xf32> -> vector<16x140xf32>
    %c0_10 = arith.constant 0 : index
    %c0_11 = arith.constant 0 : index
    %18 = vector.load %arg5[%c0_10, %c0_11] : memref<16x140xf32, #tpu.memory_space<vmem>>, vector<16x140xf32>
    %19 = arith.mulf %17, %18 : vector<16x140xf32>
    %cst_12 = arith.constant dense<0.000000e+00> : vector<140xf32>
    %20 = vector.multi_reduction <add>, %19, %cst_12 [0] : vector<16x140xf32> to vector<140xf32>
    %21 = vector.shape_cast %20 : vector<140xf32> to vector<1x140xf32>
    %c0_13 = arith.constant 0 : index
    %c0_14 = arith.constant 0 : index
    %22 = vector.load %arg6[%c0_13, %c0_14] : memref<140x10xf32, #tpu.memory_space<vmem>>, vector<140x10xf32>
    %cst_15 = arith.constant dense<0.000000e+00> : vector<1x10xf32>
    %23 = tpu.matmul %21, %22, %cst_15 {dimension_numbers = #tpu.dot_dimension_numbers<[1], [0], [0], [1], [0, 0, 1, 1], [], []>} : vector<1x140xf32>, vector<140x10xf32>, vector<1x10xf32> -> vector<1x10xf32>
    %c0_16 = arith.constant 0 : index
    %c0_17 = arith.constant 0 : index
    %24 = vector.load %arg7[%c0_16, %c0_17] : memref<1x10xf32, #tpu.memory_space<vmem>>, vector<1x10xf32>
    %25 = arith.addf %23, %24 : vector<1x10xf32>
    %c0_18 = arith.constant 0 : index
    %c0_19 = arith.constant 0 : index
    %c0_20 = arith.constant 0 : index
    %26 = vector.load %arg8[%c0_18, %c0_19, %c0_20] : memref<1x1x10xf32, #tpu.memory_space<vmem>>, vector<1x1x10xf32>
    %27 = vector.shape_cast %26 : vector<1x1x10xf32> to vector<1x10xf32>
    %28 = vector.shape_cast %25 : vector<1x10xf32> to vector<1x1x10xf32>
    tpu.vector_store %arg8[%c0_18, %c0_19, %c0_20], %28 {strides = array<i32>} : memref<1x1x10xf32, #tpu.memory_space<vmem>>, vector<1x1x10xf32>,
    return
  }
  func.func @transform_0(%arg0: i32) -> (i32, i32, i32) {
    %c0_i32 = arith.constant 0 : i32
    %c0_i32_0 = arith.constant 0 : i32
    %c0_i32_1 = arith.constant 0 : i32
    return %arg0, %c0_i32, %c0_i32_0 : i32, i32, i32
  }
  func.func @transform_1(%arg0: i32) -> (i32, i32) {
    %c0_i32 = arith.constant 0 : i32
    %c0_i32_0 = arith.constant 0 : i32
    %c0_i32_1 = arith.constant 0 : i32
    return %c0_i32, %c0_i32_0 : i32, i32
  }
  func.func @transform_2(%arg0: i32) -> (i32, i32) {
    %c0_i32 = arith.constant 0 : i32
    %c0_i32_0 = arith.constant 0 : i32
    %c0_i32_1 = arith.constant 0 : i32
    return %c0_i32, %c0_i32_0 : i32, i32
  }
  func.func @transform_3(%arg0: i32) -> (i32, i32) {
    %c0_i32 = arith.constant 0 : i32
    %c0_i32_0 = arith.constant 0 : i32
    %c0_i32_1 = arith.constant 0 : i32
    return %c0_i32, %c0_i32_0 : i32, i32
  }
  func.func @transform_4(%arg0: i32) -> (i32, i32) {
    %c0_i32 = arith.constant 0 : i32
    %c0_i32_0 = arith.constant 0 : i32
    %c0_i32_1 = arith.constant 0 : i32
    return %c0_i32, %c0_i32_0 : i32, i32
  }
  func.func @transform_5(%arg0: i32) -> (i32, i32) {
    %c0_i32 = arith.constant 0 : i32
    %c0_i32_0 = arith.constant 0 : i32
    %c0_i32_1 = arith.constant 0 : i32
    return %c0_i32, %c0_i32_0 : i32, i32
  }
  func.func @transform_6(%arg0: i32) -> (i32, i32) {
    %c0_i32 = arith.constant 0 : i32
    %c0_i32_0 = arith.constant 0 : i32
    %c0_i32_1 = arith.constant 0 : i32
    return %c0_i32, %c0_i32_0 : i32, i32
  }
  func.func @transform_7(%arg0: i32) -> (i32, i32, i32) {
    %c0_i32 = arith.constant 0 : i32
    %c0_i32_0 = arith.constant 0 : i32
    %c0_i32_1 = arith.constant 0 : i32
    return %arg0, %c0_i32, %c0_i32_0 : i32, i32, i32
  }
}

</mosaic_0001>

<bundles_post_ra>
// kernel: tpu_custom_call.1
= control target key start
LH: loop header
LB: loop body
LE: loop exit
PB: predicated region body
PF: predicated region fallthrough
CT: control target
= control target key end

     0   :  { %12 = vsyncpa [#allocation3], 0  ;;  %s2090_s0 = inlined_call_operand.vmem [shape: f32[2,64,378], index: 0, kind: input, shape index: {}]   ;;  %s2091_s1 = inlined_call_operand.vmem [shape: f32[378,224], index: 1, kind: input, shape index: {}]   ;;  %s2092_s2 = inlined_call_operand.vmem [shape: f32[1,224], index: 2, kind: input, shape index: {}]   ;;  %s2093_s3 = inlined_call_operand.vmem [shape: f32[224,140], index: 3, kind: input, shape index: {}]   ;;  %s2094_s4 = inlined_call_operand.vmem [shape: f32[16,140], index: 4, kind: input, shape index: {}]   ;;  %s2095_s5 = inlined_call_operand.vmem [shape: f32[140,10], index: 5, kind: input, shape index: {}]   ;;  %s2096_s6 = inlined_call_operand.vmem [shape: f32[1,10], index: 6, kind: input, shape index: {}]   ;;  %s2097_s7 = inlined_call_operand.hbm [shape: f32[2,1,10], index: 7, kind: output, shape index: {}]  }
   0x1   :  { %14 = vsyncpa [#allocation3 + $0x1], 0  ;;  %s1412_s24 = smov 0   ;;  %s1414_s25 = smov 0  }
   0x2   :  { %s1416_s26 = smov 0   ;;  %s1418_s27 = smov 0  }
   0x3 LB: > { %s1433_s28 = sadd.s32 4294967295, %s1366_s27   ;;  %s1025_s29 = sadd.s32 4294967294, %s1366_s27   ;;  %s1366_s27 = sphi %s1418_s27, %s2103_s27   ;;  %s1362_s26 = sphi %s1416_s26, %s2102_s26   ;;  %s1358_s25 = sphi %s1414_s25, %s2101_s25   ;;  %s1354_s24 = sphi %s1412_s24, %s2100_s24  }
   0x4   : > { %s1437_s30 = sadd.s32 1, %s1366_s27   ;;  %s179_s8 = sadd.s32 1, %s1362_s26 }
   0x5   : > { %s176_s9 = ssub.s32 %s1366_s27, %s1437_s30  ;;  %p189_p0 = scmp.ne.s32.totalorder %s1362_s26, %s1358_s25 }
   0x6   : > { %p177_p1 = scmp.eq.s32.totalorder %s176_s9, 0  ;;  %p190_p2 = scmp.eq.s32.totalorder %s1433_s28, 1 }
   0x7   : > { %p195_p3 = scmp.ne.s32.totalorder %s1358_s25, %s1354_s24  ;;  %p196_p4 = scmp.eq.s32.totalorder %s1025_s29, 1 }
   0x8   : > { %s1448_s10 = scalar_select %p177_p1, %s1362_s26, %s179_s8  }
   0x9   : > { %p1450_p5 = por %p190_p2, %p189_p0  ;;  %p1454_p6 = por %p196_p4, %p195_p3 }
   0xa   : > { %p1028_p7 = scmp.ge.s32.totalorder %s1366_s27, 1  ;;  %p240_p8 = scmp.lt.s32.totalorder %s1366_s27, 3 }
   0xc   : > { %p241_p9 = pnand %p1028_p7, %p240_p8 }
   0xd   : > { %v301_v0 = vld [vmem:[%s2091_s1 + $0x8] sm:$0xff] (!%p241_p9)  ;;  %v303_v1 = vld [vmem:[%s2091_s1 + $0x18] sm:$0xff] (!%p241_p9)  ;;  %v300_v2 = vld [vmem:[%s2091_s1] sm:$0xff] (!%p241_p9)  ;;  %p271_p10 = scmp.lt.s32.totalorder (!%p241_p9), %s1433_s28, 1  ;;  %vm433_vm0 = vcmask (!%p241_p9), 1041408   ;;  %vm1368_vm1 = vmmov (!%p241_p9), 1  }
   0xe   : > { %244 = sbr.rel (%p241_p9) target bundleno = 821 (0x335), region = 48  ;;  %v1047_v3 = vpack.c.bf16 (!%p241_p9), %v303_v1, %v301_v0  ;;  %v302_v4 = vld [vmem:[%s2091_s1 + $0x10] sm:$0xff] (!%p241_p9)  ;;  %v305_v5 = vld [vmem:[%s2091_s1 + $0x28] sm:$0xff] (!%p241_p9)  ;;  %v307_v6 = vld [vmem:[%s2091_s1 + $0x38] sm:$0xff] (!%p241_p9)  ;;  %vm408_vm3 = vcmask (!%p241_p9), 998400   ;;  %vm750_vm4 = vcmask (!%p241_p9), 785408  }
   0xf   : > { %v1049_v7 = vpack.c.bf16 (!%p241_p9), %v302_v4, %v300_v2  ;;  %v1051_v8 = vpack.c.bf16 (!%p241_p9), %v307_v6, %v305_v5  ;;  %v304_v9 = vld [vmem:[%s2091_s1 + $0x20] sm:$0xff] (!%p241_p9)  ;;  %v306_v10 = vld [vmem:[%s2091_s1 + $0x30] sm:$0xff] (!%p241_p9)  ;;  %v309_v11 = vld [vmem:[%s2091_s1 + $0x48] sm:$0xff] (!%p241_p9)  ;;  %vm881_vm5 = vcmask (!%p241_p9), 1043456   ;;  %vm849_vm7 = vcmask (!%p241_p9), 97280   ;;  %s269_s19 = sand.u32 (!%p241_p9), 1, %s1358_s25  }
  0x10   : > { %1048 = vmatprep.subr.bf16.mxu0 (!%p241_p9), %v1047_v3  ;;  %v311_v12 = vld [vmem:[%s2091_s1 + $0x58] sm:$0xff] (!%p241_p9)  ;;  %v1053_v13 = vpack.c.bf16 (!%p241_p9), %v306_v10, %v304_v9  ;;  %v308_v15 = vld [vmem:[%s2091_s1 + $0x40] sm:$0xff] (!%p241_p9)  ;;  %v310_v16 = vld [vmem:[%s2091_s1 + $0x50] sm:$0xff] (!%p241_p9)  ;;  %s1044_s22 = sshll.u32 (!%p241_p9), %s1433_s28, 4  ;;  %s270_s23 = scalar_lea.vmem (!%p241_p9), [#allocation2], %s269_s19  ;;  %vm955_vm8 = vcmask (!%p241_p9), 73728  }
  0x11   : > { %1050 = vmatpush1.bf16.msra.mxu0 (!%p241_p9), %v1049_v7  ;;  %v1055_v14 = vpack.c.bf16 (!%p241_p9), %v311_v12, %v309_v11  ;;  %v313_v17 = vld [vmem:[%s2091_s1 + $0x68] sm:$0xff] (!%p241_p9)  ;;  %v315_v18 = vld [vmem:[%s2091_s1 + $0x78] sm:$0xff] (!%p241_p9)  ;;  %v1057_v19 = vpack.c.bf16 (!%p241_p9), %v310_v16, %v308_v15  ;;  %v312_v21 = vld [vmem:[%s2091_s1 + $0x60] sm:$0xff] (!%p241_p9)  ;;  %s970_s29 = sshll.u32 (!%p241_p9), %s270_s23, 4  ;;  %s958_s9 = scalar_lea.sflag (!%p241_p9), [#allocation3], %s269_s19  ;;  %s2050_s29 = int_to_ptr.vmem [resolvable:$true] %s970_s29 }
  0x12   : > { %1052 = vmatprep.subr.bf16.mxu0 (!%p241_p9), %v1051_v8  ;;  %v1059_v20 = vpack.c.bf16 (!%p241_p9), %v315_v18, %v313_v17  ;;  %v314_v22 = vld [vmem:[%s2091_s1 + $0x70] sm:$0xff] (!%p241_p9)  ;;  %v317_v23 = vld [vmem:[%s2091_s1 + $0x88] sm:$0xff] (!%p241_p9)  ;;  %v319_v24 = vld [vmem:[%s2091_s1 + $0x98] sm:$0xff] (!%p241_p9)  ;;  %s1304_s14 = scalar_lea.vmem (!%p241_p9), %s2050_s29, 16 }
  0x13   : > { %v1061_v25 = vpack.c.bf16 (!%p241_p9), %v314_v22, %v312_v21  ;;  %v1063_v26 = vpack.c.bf16 (!%p241_p9), %v319_v24, %v317_v23  ;;  %v316_v27 = vld [vmem:[%s2091_s1 + $0x80] sm:$0xff] (!%p241_p9)  ;;  %v318_v28 = vld [vmem:[%s2091_s1 + $0x90] sm:$0xff] (!%p241_p9)  ;;  %v321_v29 = vld [vmem:[%s2091_s1 + $0xa8] sm:$0xff] (!%p241_p9)  ;;  %p1305_p11 = scmp.ne.s32.totalorder (!%p241_p9), %s2050_s29, %s1304_s14 }
  0x14   : > { %v323_v30 = vld [vmem:[%s2091_s1 + $0xb8] sm:$0xff] (!%p241_p9)  ;;  %v1065_v31 = vpack.c.bf16 (!%p241_p9), %v318_v28, %v316_v27  ;;  %v320_v33 = vld [vmem:[%s2091_s1 + $0xa0] sm:$0xff] (!%p241_p9)  ;;  %v322_v34 = vld [vmem:[%s2091_s1 + $0xb0] sm:$0xff] (!%p241_p9) }
  0x15   : > { %1054 = vmatpush1.bf16.msra.mxu0 %v1053_v13  ;;  %s272_s21 = scalar_select %p271_p10, %s1433_s28, 1  ;;  %v1067_v32 = vpack.c.bf16 %v323_v30, %v321_v29  ;;  %v325_v35 = vld [vmem:[%s2091_s1 + $0xc8] sm:$0xff]  ;;  %v327_v36 = vld [vmem:[%s2091_s1 + $0xd8] sm:$0xff]  ;;  %v1069_v37 = vpack.c.bf16 %v322_v34, %v320_v33  ;;  %v324_v39 = vld [vmem:[%s2091_s1 + $0xc0] sm:$0xff] }
  0x16   : > { %1056 = vmatprep.subr.bf16.mxu0 %v1055_v14  ;;  %v1071_v38 = vpack.c.bf16 %v327_v36, %v325_v35  ;;  %v326_v40 = vld [vmem:[%s2091_s1 + $0xd0] sm:$0xff]  ;;  %v329_v42 = vld [vmem:[%s2091_s1 + $0xe8] sm:$0xff]  ;;  %v331_v43 = vld [vmem:[%s2091_s1 + $0xf8] sm:$0xff]  ;;  %p1306_p12 = pnand %p1305_p11, %p1450_p5  ;;  %s1371_s28 = smov [#allocation2]  }
  0x17   : > { %s1261_s16 = smul.u32 192, %s272_s21  ;;  %v1073_v44 = vpack.c.bf16 %v326_v40, %v324_v39  ;;  %v1075_v45 = vpack.c.bf16 %v331_v43, %v329_v42  ;;  %v328_v46 = vld [vmem:[%s2091_s1 + $0xe0] sm:$0xff]  ;;  %v330_v47 = vld [vmem:[%s2091_s1 + $0xf0] sm:$0xff]  ;;  %v333_v48 = vld [vmem:[%s2091_s1 + $0x108] sm:$0xff]  ;;  %s2048_s21 = scalar_lea.hbm %s2097_s7, %s1044_s22 }
  0x18   : > { %v335_v49 = vld [vmem:[%s2091_s1 + $0x118] sm:$0xff]  ;;  %v1077_v50 = vpack.c.bf16 %v330_v47, %v328_v46  ;;  %v332_v52 = vld [vmem:[%s2091_s1 + $0x100] sm:$0xff]  ;;  %v334_v53 = vld [vmem:[%s2091_s1 + $0x110] sm:$0xff]  ;;  %p1307_p13 = pneg %p1306_p12  ;;  %s1308_s15 = sshll.u32 %s1371_s28, 4  ;;  %s1309_s15 = int_to_ptr.vmem [resolvable:$false] %s1308_s15 }
  0x19   : > { %1058 = vmatpush1.bf16.msra.mxu0 %v1057_v19  ;;  %s1543_s13 = scalar_lea.vmem %s2090_s0, %s1261_s16  ;;  %v1079_v51 = vpack.c.bf16 %v335_v49, %v333_v48  ;;  %v337_v54 = vld [vmem:[%s2091_s1 + $0x128] sm:$0xff]  ;;  %v339_v55 = vld [vmem:[%s2091_s1 + $0x138] sm:$0xff]  ;;  %v1081_v56 = vpack.c.bf16 %v334_v53, %v332_v52  ;;  %v336_v58 = vld [vmem:[%s2091_s1 + $0x120] sm:$0xff]  ;;  %s1310_s17 = scalar_lea.vmem %s1309_s15, 32 }
  0x1a   : > { %1060 = vmatprep.subr.bf16.mxu0 %v1059_v20  ;;  %v277_v41 = vld [vmem:[%s1543_s13 + $0x8] sm:$0xff]  ;;  %v1083_v57 = vpack.c.bf16 %v339_v55, %v337_v54  ;;  %v338_v59 = vld [vmem:[%s2091_s1 + $0x130] sm:$0xff]  ;;  %v343_v61 = vld [vmem:[%s2091_s1 + $0x158] sm:$0xff]  ;;  %p1311_p0 = scmp.lt.s32.totalorder %s2050_s29, %s1309_s15  ;;  %p1312_p1 = scmp.lt.s32.totalorder %s1310_s17, %s1304_s14 }
  0x1b   : > { %504 = vmatprep.mubr.f32.mxu0 %v277_v41  ;;  %v341_v60 = vld [vmem:[%s2091_s1 + $0x148] sm:$0xff]  ;;  %v1085_v62 = vpack.c.bf16 %v338_v59, %v336_v58  ;;  %v340_v0 = vld [vmem:[%s2091_s1 + $0x140] sm:$0xff]  ;;  %v342_v1 = vld [vmem:[%s2091_s1 + $0x150] sm:$0xff] }
  0x1c   : > { %v1087_v63 = vpack.c.bf16 %v343_v61, %v341_v60  ;;  %v345_v2 = vld [vmem:[%s2091_s1 + $0x168] sm:$0xff]  ;;  %v347_v3 = vld [vmem:[%s2091_s1 + $0x178] sm:$0xff]  ;;  %v344_v4 = vld [vmem:[%s2091_s1 + $0x160] sm:$0xff]  ;;  %v1089_v6 = vpack.c.bf16 %v342_v1, %v340_v0  ;;  %p1313_p2 = por %p1312_p1, %p1311_p0 }
  0x1d   : > { %1062 = vmatpush1.bf16.msra.mxu0 %v1061_v25  ;;  %v346_v5 = vld [vmem:[%s2091_s1 + $0x170] sm:$0xff]  ;;  %v349_v7 = vld [vmem:[%s2091_s1 + $0x188] sm:$0xff]  ;;  %v351_v8 = vld [vmem:[%s2091_s1 + $0x198] sm:$0xff]  ;;  %v1091_v10 = vpack.c.bf16 %v347_v3, %v345_v2 }
  0x1e   : > { %1064 = vmatprep.subr.bf16.mxu0 %v1063_v26  ;;  %v695_v9 = vld [vmem:[%s2093_s3 + $0x8] sm:$0xff]  ;;  %v697_v11 = vld [vmem:[%s2093_s3 + $0x18] sm:$0xff]  ;;  %v694_v12 = vld [vmem:[%s2093_s3] sm:$0xff]  ;;  %v1093_v23 = vpack.c.bf16 %v346_v5, %v344_v4  ;;  %v1095_v24 = vpack.c.bf16 %v351_v8, %v349_v7  ;;  %p1314_p3 = pnand %p1313_p2, %p1307_p13 }
  0x1f   : > { %v696_v13 = vld [vmem:[%s2093_s3 + $0x10] sm:$0xff]  ;;  %v1145_v14 = vpack.c.bf16 %v697_v11, %v695_v9  ;;  %v699_v16 = vld [vmem:[%s2093_s3 + $0x28] sm:$0xff]  ;;  %v701_v17 = vld [vmem:[%s2093_s3 + $0x38] sm:$0xff] }
  0x20   : > { %v1147_v15 = vpack.c.bf16 %v696_v13, %v694_v12  ;;  %v698_v18 = vld [vmem:[%s2093_s3 + $0x20] sm:$0xff]  ;;  %v1149_v19 = vpack.c.bf16 %v701_v17, %v699_v16  ;;  %v700_v20 = vld [vmem:[%s2093_s3 + $0x30] sm:$0xff]  ;;  %v703_v21 = vld [vmem:[%s2093_s3 + $0x48] sm:$0xff] }
  0x21   : > { %1066 = vmatpush1.bf16.msra.mxu0 %v1065_v31  ;;  %v705_v22 = vld [vmem:[%s2093_s3 + $0x58] sm:$0xff]  ;;  %1146 = vmatprep.subr.bf16.mxu1 %v1145_v14  ;;  %v348_v25 = vld [vmem:[%s2091_s1 + $0x180] sm:$0xff]  ;;  %v350_v26 = vld [vmem:[%s2091_s1 + $0x190] sm:$0xff]  ;;  %v1151_v28 = vpack.c.bf16 %v700_v20, %v698_v18 }
  0x22   : > { %1068 = vmatprep.subr.bf16.mxu0 %v1067_v32  ;;  %v353_v27 = vld [vmem:[%s2091_s1 + $0x1a8] sm:$0xff]  ;;  %1148 = vmatpush1.bf16.msra.mxu1 %v1147_v15  ;;  %v355_v29 = vld [vmem:[%s2091_s1 + $0x1b8] sm:$0xff]  ;;  %v1153_v30 = vpack.c.bf16 %v705_v22, %v703_v21  ;;  %v702_v31 = vld [vmem:[%s2093_s3 + $0x40] sm:$0xff]  ;;  %v1097_v35 = vpack.c.bf16 %v350_v26, %v348_v25 }
  0x23   : > { %1150 = vmatprep.subr.bf16.mxu1 %v1149_v19  ;;  %v704_v32 = vld [vmem:[%s2093_s3 + $0x50] sm:$0xff]  ;;  %v707_v33 = vld [vmem:[%s2093_s3 + $0x68] sm:$0xff]  ;;  %v709_v34 = vld [vmem:[%s2093_s3 + $0x78] sm:$0xff]  ;;  %v1099_v36 = vpack.c.bf16 %v355_v29, %v353_v27 }
  0x24   : > { %v357_v39 = vld [vmem:[%s2091_s1 + $0x1c8] sm:$0xff]  ;;  %v1155_v40 = vpack.c.bf16 %v704_v32, %v702_v31  ;;  %v359_v41 = vld [vmem:[%s2091_s1 + $0x1d8] sm:$0xff]  ;;  %v1157_v42 = vpack.c.bf16 %v709_v34, %v707_v33  ;;  %v706_v43 = vld [vmem:[%s2093_s3 + $0x60] sm:$0xff] }
  0x25   : > { %1070 = vmatpush1.bf16.msra.mxu0 %v1069_v37  ;;  %v352_v37 = vld [vmem:[%s2091_s1 + $0x1a0] sm:$0xff]  ;;  %v713_v46 = vld [vmem:[%s2093_s3 + $0x98] sm:$0xff]  ;;  %v1103_v48 = vpack.c.bf16 %v359_v41, %v357_v39  ;;  %v365_v0 = vld [vmem:[%s2091_s1 + $0x208] sm:$0xff] }
  0x26   : > { %1072 = vmatprep.subr.bf16.mxu0 %v1071_v38  ;;  %v354_v38 = vld [vmem:[%s2091_s1 + $0x1b0] sm:$0xff]  ;;  %1152 = vmatpush1.bf16.msra.mxu1 %v1151_v28  ;;  %v356_v49 = vld [vmem:[%s2091_s1 + $0x1c0] sm:$0xff]  ;;  %v363_v53 = vld [vmem:[%s2091_s1 + $0x1f8] sm:$0xff] }
  0x27   : > { %1154 = vmatprep.subr.bf16.mxu1 %v1153_v30  ;;  %v1101_v47 = vpack.c.bf16 %v354_v38, %v352_v37  ;;  %v710_v55 = vld [vmem:[%s2093_s3 + $0x80] sm:$0xff]  ;;  %v717_v58 = vld [vmem:[%s2093_s3 + $0xb8] sm:$0xff]  ;;  %v369_v7 = vld [vmem:[%s2091_s1 + $0x228] sm:$0xff] }
  0x28   : > { %v360_v61 = vld [vmem:[%s2091_s1 + $0x1e0] sm:$0xff]  ;;  %v367_v1 = vld [vmem:[%s2091_s1 + $0x218] sm:$0xff]  ;;  %v370_v14 = vld [vmem:[%s2091_s1 + $0x230] sm:$0xff] }
  0x29   : > { %1074 = vmatpush1.bf16.msra.mxu0 %v1073_v44  ;;  %v708_v44 = vld [vmem:[%s2093_s3 + $0x70] sm:$0xff]  ;;  %v1111_v4 = vpack.c.bf16 %v367_v1, %v365_v0  ;;  %v364_v5 = vld [vmem:[%s2091_s1 + $0x200] sm:$0xff]  ;;  %v371_v8 = vld [vmem:[%s2091_s1 + $0x238] sm:$0xff]  ;;  %v1369_v1 = vmov 0.0  }
  0x2a   : > { %1076 = vmatprep.subr.bf16.mxu0 %v1075_v45  ;;  %v711_v45 = vld [vmem:[%s2093_s3 + $0x88] sm:$0xff]  ;;  %1156 = vmatpush1.bf16.msra.mxu1 %v1155_v40  ;;  %v1159_v52 = vpack.c.bf16 %v708_v44, %v706_v43  ;;  %v276_v9 = vld [vmem:[%s1543_s13] sm:$0xff]  ;;  %v1115_v12 = vpack.c.bf16 %v371_v8, %v369_v7  ;;  %v375_v16 = vld [vmem:[%s2091_s1 + $0x258] sm:$0xff] }
  0x2b   : > { %1158 = vmatprep.subr.bf16.mxu1 %v1157_v42  ;;  %v1161_v54 = vpack.c.bf16 %v713_v46, %v711_v45  ;;  %v280_v11 = vld [vmem:[%s1543_s13 + $0x20] sm:$0xff]  ;;  %v373_v15 = vld [vmem:[%s2091_s1 + $0x248] sm:$0xff]  ;;  %v279_v17 = vld [vmem:[%s1543_s13 + $0x18] sm:$0xff] }
  0x2c   : > { %v368_v13 = vld [vmem:[%s2091_s1 + $0x220] sm:$0xff]  ;;  %v283_v19 = vld [vmem:[%s1543_s13 + $0x38] sm:$0xff]  ;;  %v1119_v20 = vpack.c.bf16 %v375_v16, %v373_v15  ;;  %v374_v22 = vld [vmem:[%s2091_s1 + $0x250] sm:$0xff] }
  0x2d   : > { %1078 = vmatpush1.bf16.msra.mxu0 %v1077_v50  ;;  %v358_v50 = vld [vmem:[%s2091_s1 + $0x1d0] sm:$0xff]  ;;  %v1117_v18 = vpack.c.bf16 %v370_v14, %v368_v13  ;;  %v372_v21 = vld [vmem:[%s2091_s1 + $0x240] sm:$0xff]  ;;  %v381_v31 = vld [vmem:[%s2091_s1 + $0x288] sm:$0xff] }
  0x2e   : > { %1080 = vmatprep.subr.bf16.mxu0 %v1079_v51  ;;  %v361_v51 = vld [vmem:[%s2091_s1 + $0x1e8] sm:$0xff]  ;;  %v1105_v59 = vpack.c.bf16 %v358_v50, %v356_v49  ;;  %1160 = vmatpush1.bf16.msra.mxu1 %v1159_v52  ;;  %v282_v25 = vld [vmem:[%s1543_s13 + $0x30] sm:$0xff]  ;;  %v1121_v26 = vpack.c.bf16 %v374_v22, %v372_v21  ;;  %v376_v29 = vld [vmem:[%s2091_s1 + $0x260] sm:$0xff] }
  0x2f   : > { %v1107_v60 = vpack.c.bf16 %v363_v53, %v361_v51  ;;  %1162 = vmatprep.subr.bf16.mxu1 %v1161_v54  ;;  %v286_v27 = vld [vmem:[%s1543_s13 + $0x50] sm:$0xff]  ;;  %v383_v32 = vld [vmem:[%s2091_s1 + $0x298] sm:$0xff]  ;;  %v285_v33 = vld [vmem:[%s1543_s13 + $0x48] sm:$0xff] }
  0x30   : > { %v378_v30 = vld [vmem:[%s2091_s1 + $0x270] sm:$0xff]  ;;  %v380_v37 = vld [vmem:[%s2091_s1 + $0x280] sm:$0xff]  ;;  %v385_v39 = vld [vmem:[%s2091_s1 + $0x2a8] sm:$0xff] }
  0x31   : > { %1082 = vmatpush1.bf16.msra.mxu0 %v1081_v56  ;;  %v712_v56 = vld [vmem:[%s2093_s3 + $0x90] sm:$0xff]  ;;  %v1125_v34 = vpack.c.bf16 %v378_v30, %v376_v29  ;;  %v387_v40 = vld [vmem:[%s2091_s1 + $0x2b8] sm:$0xff]  ;;  %v288_v41 = vld [vmem:[%s1543_s13 + $0x60] sm:$0xff] }
  0x32   : > { %1084 = vmatprep.subr.bf16.mxu0 %v1083_v57  ;;  %v715_v57 = vld [vmem:[%s2093_s3 + $0xa8] sm:$0xff]  ;;  %v382_v38 = vld [vmem:[%s2091_s1 + $0x290] sm:$0xff]  ;;  %v292_v43 = vld [vmem:[%s1543_s13 + $0x80] sm:$0xff]  ;;  %v1131_v44 = vpack.c.bf16 %v387_v40, %v385_v39 }
  0x33   : > { %v1165_v2 = vpack.c.bf16 %v717_v58, %v715_v57  ;;  %v1129_v42 = vpack.c.bf16 %v382_v38, %v380_v37  ;;  %v384_v45 = vld [vmem:[%s2091_s1 + $0x2a0] sm:$0xff]  ;;  %v386_v46 = vld [vmem:[%s2091_s1 + $0x2b0] sm:$0xff]  ;;  %v291_v49 = vld [vmem:[%s1543_s13 + $0x78] sm:$0xff] }
  0x34   : > { %v1133_v50 = vpack.c.bf16 %v386_v46, %v384_v45  ;;  %v295_v51 = vld [vmem:[%s1543_s13 + $0x98] sm:$0xff]  ;;  %v388_v53 = vld [vmem:[%s2091_s1 + $0x2c0] sm:$0xff]  ;;  %v390_v54 = vld [vmem:[%s2091_s1 + $0x2d0] sm:$0xff] }
  0x35   : > { %1086 = vmatpush1.bf16.msra.mxu0 %v1085_v62  ;;  %v362_v62 = vld [vmem:[%s2091_s1 + $0x1f0] sm:$0xff]  ;;  %v1137_v58 = vpack.c.bf16 %v390_v54, %v388_v53  ;;  %vm1140_vm2 = vmpackc.low %vm433_vm0, %vm1368_vm1  ;;  %v293_v7 = vld [vmem:[%s1543_s13 + $0x88] sm:$0xff] }
  0x36   : > { %1088 = vmatprep.subr.bf16.mxu0 %v1087_v63  ;;  %v1163_v63 = vpack.c.bf16 %v712_v56, %v710_v55  ;;  %v1109_v3 = vpack.c.bf16 %v362_v62, %v360_v61  ;;  %v393_v55 = vld [vmem:[%s2091_s1 + $0x2e8] sm:$0xff]  ;;  %v395_v56 = vld [vmem:[%s2091_s1 + $0x2f8] sm:$0x3]  ;;  %v294_v57 = vld [vmem:[%s1543_s13 + $0x90] sm:$0xff] }
  0x37   : > { %v392_v61 = vld [vmem:[%s2091_s1 + $0x2e0] sm:$0xff]  ;;  %v394_v62 = vld [vmem:[%s2091_s1 + $0x2f0] sm:$0x3]  ;;  %v719_v13 = vld [vmem:[%s2093_s3 + $0xc8] sm:$0xff] }
  0x38   : > { %1164 = vmatpush1.bf16.msra.mxu1 %v1163_v63  ;;  %v297_v63 = vld [vmem:[%s1543_s13 + $0xa8] sm:$0xff]  ;;  %v1142_v0 = vpack.c.bf16 %v394_v62, %v392_v61  ;;  %v296_v8 = vld [vmem:[%s1543_s13 + $0xa0] sm:$0xff]  ;;  %v721_v14 = vld [vmem:[%s2093_s3 + $0xd8] sm:$0xff]  ;;  %v1370_v61 = vmov 0.0|0.0   ;;  %v398_v62 = vlaneseq }
  0x39   : > { %1090 = vmatpush1.bf16.msra.mxu0 %v1089_v6  ;;  %v366_v6 = vld [vmem:[%s2091_s1 + $0x210] sm:$0xff]  ;;  %1166 = vmatprep.subr.bf16.mxu1 %v1165_v2  ;;  %v1169_v15 = vpack.c.bf16 %v721_v14, %v719_v13  ;;  %v718_v16 = vld [vmem:[%s2093_s3 + $0xc0] sm:$0xff]  ;;  %v735_v37 = vld [vmem:[%s2093_s3 + $0x148] sm:$0xff] }
  0x3a   : > { %1092 = vmatprep.subr.bf16.mxu0 %v1091_v10  ;;  %v1113_v10 = vpack.c.bf16 %v366_v6, %v364_v5  ;;  %v278_v2 = vld [vmem:[%s1543_s13 + $0x10] sm:$0xff]  ;;  %v287_v5 = vld [vmem:[%s1543_s13 + $0x58] sm:$0xff]  ;;  %v722_v22 = vld [vmem:[%s2093_s3 + $0xe0] sm:$0xff] }
  0x3b   : > { %v290_v6 = vld [vmem:[%s1543_s13 + $0x70] sm:$0xff]  ;;  %v737_v38 = vld [vmem:[%s2093_s3 + $0x158] sm:$0xff]  ;;  %v734_v40 = vld [vmem:[%s2093_s3 + $0x140] sm:$0xff] }
  0x3c   : > { %v728_v29 = vld [vmem:[%s2093_s3 + $0x110] sm:$0xff]  ;;  %v1185_v39 = vpack.c.bf16 %v737_v38, %v735_v37  ;;  %v738_v46 = vld [vmem:[%s2093_s3 + $0x160] sm:$0xff]  ;;  %vm1227_vm6 = vmpackc.low %vm881_vm5, %vm1368_vm1 }
  0x3d   : > { %1094 = vmatpush1.bf16.msra.mxu0 %v1093_v23  ;;  %v377_v23 = vld [vmem:[%s2091_s1 + $0x268] sm:$0xff]  ;;  %v744_v53 = vld [vmem:[%s2093_s3 + $0x190] sm:$0xff] }
  0x3e   : > { %1096 = vmatprep.subr.bf16.mxu0 %v1095_v24  ;;  %v379_v24 = vld [vmem:[%s2091_s1 + $0x278] sm:$0xff] }
  0x3f   : > { %v1123_v28 = vpack.c.bf16 %v379_v24, %v377_v23  ;;  %v724_v23 = vld [vmem:[%s2093_s3 + $0xf0] sm:$0xff] }
  0x40   : > { %v1175_v24 = vpack.c.bf16 %v724_v23, %v722_v22 }
  0x41   : > { %1098 = vmatpush1.bf16.msra.mxu0 %v1097_v35  ;;  %v289_v35 = vld [vmem:[%s1543_s13 + $0x68] sm:$0xff] }
  0x42   : > { %1100 = vmatprep.subr.bf16.mxu0 %v1099_v36  ;;  %v1127_v36 = vpack.c.bf16 %v383_v32, %v381_v31  ;;  %v731_v31 = vld [vmem:[%s2093_s3 + $0x128] sm:$0xff]  ;;  %v733_v32 = vld [vmem:[%s2093_s3 + $0x138] sm:$0xff] }
  0x45   : > { %1102 = vmatpush1.bf16.msra.mxu0 %v1101_v47  ;;  %v389_v47 = vld [vmem:[%s2091_s1 + $0x2c8] sm:$0xff] }
  0x46   : > { %1104 = vmatprep.subr.bf16.mxu0 %v1103_v48  ;;  %v391_v48 = vld [vmem:[%s2091_s1 + $0x2d8] sm:$0xff] }
  0x47   : > { %v1135_v52 = vpack.c.bf16 %v391_v48, %v389_v47  ;;  %v740_v47 = vld [vmem:[%s2093_s3 + $0x170] sm:$0xff] }
  0x48   : > { %v1191_v48 = vpack.c.bf16 %v740_v47, %v738_v46 }
  0x49   : > { %1106 = vmatpush1.bf16.msra.mxu0 %v1105_v59  ;;  %v298_v59 = vld [vmem:[%s1543_s13 + $0xb0] sm:$0xff] }
  0x4a   : > { %1108 = vmatprep.subr.bf16.mxu0 %v1107_v60  ;;  %v1139_v60 = vpack.c.bf16 %v395_v56, %v393_v55  ;;  %v747_v55 = vld [vmem:[%s2093_s3 + $0x1a8] sm:$0xff]  ;;  %v749_v56 = vld [vmem:[%s2093_s3 + $0x1b8] sm:$0xff] }
  0x4d   : > { %1110 = vmatpush1.bf16.msra.mxu0 %v1109_v3  ;;  %v281_v3 = vld [vmem:[%s1543_s13 + $0x28] sm:$0xff] }
  0x4e   : > { %1112 = vmatprep.subr.bf16.mxu0 %v1111_v4  ;;  %v284_v4 = vld [vmem:[%s1543_s13 + $0x40] sm:$0xff] }
  0x50   : > { %505 = vmatmul.mubr.f32.vlgmr.msra.gmra.mrb[0].mxu0 %v276_v9  ;;  %v299_v9 = vld [vmem:[%s1543_s13 + $0xb8] sm:$0xff] }
  0x51   : > { %1114 = vmatpush1.bf16.msra.mxu0 %v1113_v10  ;;  %510 = vmatprep.mubr.f32.mxu0 %v280_v11  ;;  %v714_v10 = vld [vmem:[%s2093_s3 + $0xa0] sm:$0xff]  ;;  %v716_v11 = vld [vmem:[%s2093_s3 + $0xb0] sm:$0xff] }
  0x52   : > { %1116 = vmatprep.subr.bf16.mxu0 %v1115_v12  ;;  %v1167_v12 = vpack.c.bf16 %v716_v11, %v714_v10 }
  0x54   : > { %511 = vmatmul.mubr.f32.gmra.mrb[2].mxu0 %v279_v17  ;;  %1168 = vmatpush1.bf16.msra.mxu1 %v1167_v12  ;;  %v720_v17 = vld [vmem:[%s2093_s3 + $0xd0] sm:$0xff] }
  0x55   : > { %1118 = vmatpush1.bf16.msra.mxu0 %v1117_v18  ;;  %516 = vmatprep.mubr.f32.mxu0 %v283_v19  ;;  %v1171_v18 = vpack.c.bf16 %v720_v17, %v718_v16  ;;  %v723_v19 = vld [vmem:[%s2093_s3 + $0xe8] sm:$0xff] }
  0x56   : > { %1120 = vmatprep.subr.bf16.mxu0 %v1119_v20  ;;  %1170 = vmatprep.subr.bf16.mxu1 %v1169_v15  ;;  %v725_v20 = vld [vmem:[%s2093_s3 + $0xf8] sm:$0xff] }
  0x57   : > { %v1173_v21 = vpack.c.bf16 %v725_v20, %v723_v19 }
  0x58   : > { %517 = vmatmul.mubr.f32.gmra.mrb[4].mxu0 %v282_v25  ;;  %1172 = vmatpush1.bf16.msra.mxu1 %v1171_v18  ;;  %v727_v25 = vld [vmem:[%s2093_s3 + $0x108] sm:$0xff] }
  0x59   : > { %1122 = vmatpush1.bf16.msra.mxu0 %v1121_v26  ;;  %522 = vmatprep.mubr.f32.mxu0 %v286_v27  ;;  %v729_v26 = vld [vmem:[%s2093_s3 + $0x118] sm:$0xff] }
  0x5a   : > { %1124 = vmatprep.subr.bf16.mxu0 %v1123_v28  ;;  %1174 = vmatprep.subr.bf16.mxu1 %v1173_v21  ;;  %v1177_v27 = vpack.c.bf16 %v729_v26, %v727_v25  ;;  %v726_v28 = vld [vmem:[%s2093_s3 + $0x100] sm:$0xff] }
  0x5b   : > { %v1179_v30 = vpack.c.bf16 %v728_v29, %v726_v28 }
  0x5c   : > { %523 = vmatmul.mubr.f32.gmra.mrb[6].mxu0 %v285_v33  ;;  %1176 = vmatpush1.bf16.msra.mxu1 %v1175_v24  ;;  %v1181_v33 = vpack.c.bf16 %v733_v32, %v731_v31 }
  0x5d   : > { %1126 = vmatpush1.bf16.msra.mxu0 %v1125_v34  ;;  %528 = vmatprep.mubr.f32.mxu0 %v289_v35  ;;  %v730_v34 = vld [vmem:[%s2093_s3 + $0x120] sm:$0xff]  ;;  %v732_v35 = vld [vmem:[%s2093_s3 + $0x130] sm:$0xff] }
  0x5e   : > { %1128 = vmatprep.subr.bf16.mxu0 %v1127_v36  ;;  %1178 = vmatprep.subr.bf16.mxu1 %v1177_v27  ;;  %v1183_v36 = vpack.c.bf16 %v732_v35, %v730_v34 }
  0x60   : > { %529 = vmatmul.mubr.f32.gmra.mrb[8].mxu0 %v288_v41  ;;  %1180 = vmatpush1.bf16.msra.mxu1 %v1179_v30  ;;  %v736_v41 = vld [vmem:[%s2093_s3 + $0x150] sm:$0xff] }
  0x61   : > { %1130 = vmatpush1.bf16.msra.mxu0 %v1129_v42  ;;  %534 = vmatprep.mubr.f32.mxu0 %v292_v43  ;;  %v1187_v42 = vpack.c.bf16 %v736_v41, %v734_v40  ;;  %v739_v43 = vld [vmem:[%s2093_s3 + $0x168] sm:$0xff] }
  0x62   : > { %1132 = vmatprep.subr.bf16.mxu0 %v1131_v44  ;;  %1182 = vmatprep.subr.bf16.mxu1 %v1181_v33  ;;  %v741_v44 = vld [vmem:[%s2093_s3 + $0x178] sm:$0xff] }
  0x63   : > { %v1189_v45 = vpack.c.bf16 %v741_v44, %v739_v43 }
  0x64   : > { %535 = vmatmul.mubr.f32.gmra.mrb[10].mxu0 %v291_v49  ;;  %1184 = vmatpush1.bf16.msra.mxu1 %v1183_v36  ;;  %v743_v49 = vld [vmem:[%s2093_s3 + $0x188] sm:$0xff] }
  0x65   : > { %1134 = vmatpush1.bf16.msra.mxu0 %v1133_v50  ;;  %540 = vmatprep.mubr.f32.mxu0 %v295_v51  ;;  %v745_v50 = vld [vmem:[%s2093_s3 + $0x198] sm:$0xff] }
  0x66   : > { %1136 = vmatprep.subr.bf16.mxu0 %v1135_v52  ;;  %1186 = vmatprep.subr.bf16.mxu1 %v1185_v39  ;;  %v1193_v51 = vpack.c.bf16 %v745_v50, %v743_v49  ;;  %v742_v52 = vld [vmem:[%s2093_s3 + $0x180] sm:$0xff] }
  0x67   : > { %v1195_v54 = vpack.c.bf16 %v744_v53, %v742_v52  ;;  %v859_v53 = vld [vmem:[%s2095_s5] sm:$0xff] }
  0x68   : > { %541 = vmatmul.mubr.f32.gmra.mrb[12].mxu0 %v294_v57  ;;  %1188 = vmatpush1.bf16.msra.mxu1 %v1187_v42  ;;  %v1197_v57 = vpack.c.bf16 %v749_v56, %v747_v55 }
  0x69   : > { %1138 = vmatpush1.bf16.msra.mxu0 %v1137_v58  ;;  %546 = vmatprep.mubr.f32.mxu0 %v298_v59  ;;  %v746_v58 = vld [vmem:[%s2093_s3 + $0x1a0] sm:$0xff]  ;;  %v748_v59 = vld [vmem:[%s2093_s3 + $0x1b0] sm:$0xff] }
  0x6a   : > { %1141 = vmatprep.subr.msk.bf16.mxu0 %vm1140_vm2, %v1139_v60  ;;  %1190 = vmatprep.subr.bf16.mxu1 %v1189_v45  ;;  %v1199_v60 = vpack.c.bf16 %v748_v59, %v746_v58 }
  0x6c   : > { %547 = vmatmul.mubr.f32.gmra.mrb[14].mxu0 %v297_v63  ;;  %1192 = vmatpush1.bf16.msra.mxu1 %v1191_v48  ;;  %v399_v63 = vshrl.u32 %v398_v62, 7 }
  0x6d   : > { %1144 = vmatpush1.bf16.msk.msra.mxu0 %vm1140_vm2, %v1142_v0  ;;  %617 = vmatprep.mubr.f32.mxu0 %v1369_v1 }
  0x6e   : > { %1194 = vmatprep.subr.bf16.mxu1 %v1193_v51  ;;  %v400_v0 = vsub.s32 0, %v399_v63 }
  0x70   : > { %1032 = vmatmul.mubr.msk.f32.vlgmr.msra.gmra.mrb[0].mxu0 %vm408_vm3, %v278_v2  ;;  %1196 = vmatpush1.bf16.msra.mxu1 %v1195_v54  ;;  %v860_v54 = vld [vmem:[%s2095_s5 + $0x8] sm:$0xff] }
  0x71   : > { %623 = vmatprep.mubr.f32.mxu0 %v1369_v1  ;;  %1198 = vmatprep.subr.bf16.mxu1 %v1197_v57 }
  0x74   : > { %1033 = vmatmul.mubr.msk.f32.gmra.mrb[2].mxu0 %vm408_vm3, %v281_v3  ;;  %1200 = vmatpush1.bf16.msra.mxu1 %v1199_v60  ;;  %v404_v3 = vsub.s32 1, %v399_v63 }
  0x75   : > { %629 = vmatprep.mubr.f32.mxu0 %v1369_v1  ;;  %1201 = vmatprep.subr.bf16.mxu1 %v1370_v61 }
  0x78   : > { %1034 = vmatmul.mubr.msk.f32.gmra.mrb[4].mxu0 %vm408_vm3, %v284_v4 }
  0x79   : > { %635 = vmatprep.mubr.f32.mxu0 %v1369_v1 }
  0x7c   : > { %1035 = vmatmul.mubr.msk.f32.gmra.mrb[6].mxu0 %vm408_vm3, %v287_v5 }
  0x7d   : > { %641 = vmatprep.mubr.f32.mxu0 %v1369_v1 }
  0x80   : > { %1036 = vmatmul.mubr.msk.f32.gmra.mrb[8].mxu0 %vm408_vm3, %v290_v6 }
  0x81   : > { %647 = vmatprep.mubr.f32.mxu0 %v1369_v1 }
  0x84   : > { %1037 = vmatmul.mubr.msk.f32.gmra.mrb[10].mxu0 %vm408_vm3, %v293_v7 }
  0x85   : > { %653 = vmatprep.mubr.f32.mxu0 %v1369_v1 }
  0x88   : > { %1038 = vmatmul.mubr.msk.f32.gmra.mrb[12].mxu0 %vm408_vm3, %v296_v8 }
  0x89   : > { %659 = vmatprep.mubr.f32.mxu0 %v1369_v1  ;;  %v396_v1 = vld [vmem:[%s2092_s2] sm:$0x3] }
  0x8a   : > { %v401_v5 = vrot.slane %v396_v1, %v400_v0  ;;  %v405_v6 = vrot.slane %v396_v1, %v404_v3  ;;  %v1202_v0 = vpack.c.bf16 %v860_v54, %v859_v53  ;;  %v862_v3 = vld [vmem:[%s2095_s5 + $0x18] sm:$0xff] }
  0x8c   : > { %1039 = vmatmul.mubr.msk.f32.gmra.mrb[14].mxu0 %vm408_vm3, %v299_v9 }
 0x143   : > { %v619_v2 = vpop.f32.mrb[0].mxu0 }
 0x144   : > { %v621_v4 = vpop.f32.mrb[1].mxu0  ;;  %v1229_v9 = vadd.f32 %v619_v2, %v401_v5  ;;  %v861_v2 = vld [vmem:[%s2095_s5 + $0x10] sm:$0xff] }
 0x145   : > { %v1230_v10 = vadd.f32 %v621_v4, %v405_v6 }
 0x146   : > { %v666_v15 = vmax.f32 %v1229_v9, 0.0  ;;  %v864_v9 = vld [vmem:[%s2095_s5 + $0x28] sm:$0xff] }
 0x147   : > { %v625_v7 = vpop.f32.mrb[2].mxu0  ;;  %v667_v18 = vmax.f32 %v1230_v10, 0.0 }
 0x148   : > { %v627_v8 = vpop.f32.mrb[3].mxu0  ;;  %v1231_v16 = vadd.f32 %v625_v7, %v401_v5  ;;  %v1205_v7 = vpack.c.bf16 %v862_v3, %v861_v2 }
 0x149   : > { %v1232_v19 = vadd.f32 %v627_v8, %v405_v6  ;;  %v863_v8 = vld [vmem:[%s2095_s5 + $0x20] sm:$0xff] }
 0x14a   : > { %v668_v27 = vmax.f32 %v1231_v16, 0.0  ;;  %v1208_v10 = vpack.c.bf16 %v864_v9, %v863_v8 }
 0x14b   : > { %v631_v11 = vpop.f32.mrb[4].mxu0  ;;  %v669_v29 = vmax.f32 %v1232_v19, 0.0 }
 0x14c   : > { %v1233_v12 = vadd.f32 %v631_v11, %v401_v5  ;;  %v633_v13 = vpop.f32.mrb[5].mxu0  ;;  %v865_v11 = vld [vmem:[%s2095_s5 + $0x30] sm:$0xff] }
 0x14d   : > { %v1234_v14 = vadd.f32 %v633_v13, %v405_v6 }
 0x14e   : > { %v670_v17 = vmax.f32 %v1233_v12, 0.0  ;;  %v866_v12 = vld [vmem:[%s2095_s5 + $0x38] sm:$0xff] }
 0x14f   : > { %v671_v20 = vmax.f32 %v1234_v14, 0.0  ;;  %v637_v21 = vpop.f32.mrb[6].mxu0  ;;  %v1211_v13 = vpack.c.bf16 %v866_v12, %v865_v11  ;;  %v867_v14 = vld [vmem:[%s2095_s5 + $0x40] sm:$0xff] }
 0x150   : > { %v682_v22 = vmax.f32 %v666_v15, %v670_v17  ;;  %v1235_v23 = vadd.f32 %v637_v21, %v401_v5  ;;  %v639_v24 = vpop.f32.mrb[7].mxu0  ;;  %v868_v15 = vld [vmem:[%s2095_s5 + $0x48] sm:$0xff]  ;;  %v869_v17 = vld [vmem:[%s2095_s5 + $0x50] sm:$0xff] }
 0x151   : > { %v683_v25 = vmax.f32 %v667_v18, %v671_v20  ;;  %v1236_v26 = vadd.f32 %v639_v24, %v405_v6  ;;  %v1214_v16 = vpack.c.bf16 %v868_v15, %v867_v14  ;;  %v870_v18 = vld [vmem:[%s2095_s5 + $0x58] sm:$0xff]  ;;  %v871_v20 = vld [vmem:[%s2095_s5 + $0x60] sm:$0xff]  ;;  %v872_v21 = vld [vmem:[%s2095_s5 + $0x68] sm:$0xff] }
 0x152   : > { %v672_v28 = vmax.f32 %v1235_v23, 0.0  ;;  %v1217_v19 = vpack.c.bf16 %v870_v18, %v869_v17  ;;  %v873_v23 = vld [vmem:[%s2095_s5 + $0x70] sm:$0xff]  ;;  %v874_v24 = vld [vmem:[%s2095_s5 + $0x78] sm:$0xff] }
 0x153   : > { %v673_v30 = vmax.f32 %v1236_v26, 0.0  ;;  %v643_v31 = vpop.f32.mrb[8].mxu0  ;;  %v875_v26 = vld [vmem:[%s2095_s5 + $0x80] sm:$0xff] }
 0x154   : > { %v684_v32 = vmax.f32 %v668_v27, %v672_v28  ;;  %v645_v33 = vpop.f32.mrb[9].mxu0  ;;  %v1237_v37 = vadd.f32 %v643_v31, %v401_v5  ;;  %v876_v27 = vld [vmem:[%s2095_s5 + $0x88] sm:$0xf] }
 0x155   : > { %v685_v34 = vmax.f32 %v669_v29, %v673_v30  ;;  %v1238_v38 = vadd.f32 %v645_v33, %v405_v6  ;;  %v1226_v28 = vpack.c.bf16 %v876_v27, %v875_v26  ;;  %v835_v31 = vld [vmem:[%s2094_s4 + $0x8] sm:$0xff]  ;;  %v837_v33 = vld [vmem:[%s2094_s4 + $0x18] sm:$0xff] }
 0x156   : > { %v674_v43 = vmax.f32 %v1237_v37, 0.0 }
 0x157   : > { %v649_v35 = vpop.f32.mrb[10].mxu0  ;;  %v675_v46 = vmax.f32 %v1238_v38, 0.0 }
 0x158   : > { %v651_v36 = vpop.f32.mrb[11].mxu0  ;;  %v1239_v44 = vadd.f32 %v649_v35, %v401_v5 }
 0x159   : > { %v1240_v47 = vadd.f32 %v651_v36, %v405_v6 }
 0x15a   : > { %v676_v57 = vmax.f32 %v1239_v44, 0.0 }
 0x15b   : > { %v655_v39 = vpop.f32.mrb[12].mxu0  ;;  %v677_v60 = vmax.f32 %v1240_v47, 0.0 }
 0x15c   : > { %v1241_v40 = vadd.f32 %v655_v39, %v401_v5  ;;  %v657_v41 = vpop.f32.mrb[13].mxu0 }
 0x15d   : > { %v1242_v42 = vadd.f32 %v657_v41, %v405_v6 }
 0x15e   : > { %v678_v45 = vmax.f32 %v1241_v40, 0.0 }
 0x15f   : > { %v679_v48 = vmax.f32 %v1242_v42, 0.0  ;;  %v661_v49 = vpop.f32.mrb[14].mxu0 }
 0x160   : > { %v686_v50 = vmax.f32 %v674_v43, %v678_v45  ;;  %v1243_v51 = vadd.f32 %v661_v49, %v401_v5  ;;  %v663_v52 = vpop.f32.mrb[15].mxu0 }
 0x161   : > { %v687_v55 = vmax.f32 %v675_v46, %v679_v48  ;;  %v1244_v56 = vadd.f32 %v663_v52, %v405_v6 }
 0x162   : > { %v680_v58 = vmax.f32 %v1243_v51, 0.0  ;;  %v690_v59 = vmax.f32 %v682_v22, %v686_v50  ;;  %v1220_v22 = vpack.c.bf16 %v872_v21, %v871_v20 }
 0x163   : > { %v681_v62 = vmax.f32 %v1244_v56, 0.0  ;;  %v691_v63 = vmax.f32 %v683_v25, %v687_v55  ;;  %v1223_v25 = vpack.c.bf16 %v874_v24, %v873_v23  ;;  %v877_v56 = vld [vmem:[%s2096_s6] sm:$0x1] }
 0x164   : > { %v688_v1 = vmax.f32 %v676_v57, %v680_v58 }
 0x165   : > { %v689_v4 = vmax.f32 %v677_v60, %v681_v62  ;;  %1040 = vmatprep.mubr.msk.f32.mxu1 %vm750_vm4, %v691_v63 }
 0x166   : > { %822 = vmatmul.mubr.f32.vlgmr.msra.gmra.mrb[0].mxu1 %v690_v59  ;;  %v692_v5 = vmax.f32 %v684_v32, %v688_v1  ;;  %v836_v32 = vld [vmem:[%s2094_s4 + $0x10] sm:$0xff] }
 0x167   : > { %v693_v6 = vmax.f32 %v685_v34, %v689_v4  ;;  %1203 = vmatpush1.bf16.msra.mxu1 %v1202_v0 }
 0x168   : > { %1204 = vmatprep.subr.bf16.mxu1 %v1370_v61 }
 0x169   : > { %1041 = vmatprep.mubr.msk.f32.mxu1 %vm750_vm4, %v693_v6 }
 0x16a   : > { %828 = vmatmul.mubr.f32.gmra.mrb[2].mxu1 %v692_v5 }
 0x16b   : > { %1206 = vmatpush1.bf16.msra.mxu1 %v1205_v7 }
 0x16c   : > { %1207 = vmatprep.subr.bf16.mxu1 %v1370_v61 }
 0x16f   : > { %1209 = vmatpush1.bf16.msra.mxu1 %v1208_v10 }
 0x170   : > { %1210 = vmatprep.subr.bf16.mxu1 %v1370_v61 }
 0x173   : > { %1212 = vmatpush1.bf16.msra.mxu1 %v1211_v13 }
 0x174   : > { %1213 = vmatprep.subr.bf16.mxu1 %v1370_v61 }
 0x177   : > { %1215 = vmatpush1.bf16.msra.mxu1 %v1214_v16 }
 0x178   : > { %1216 = vmatprep.subr.bf16.mxu1 %v1370_v61 }
 0x17b   : > { %1218 = vmatpush1.bf16.msra.mxu1 %v1217_v19 }
 0x17c   : > { %1219 = vmatprep.subr.bf16.mxu1 %v1370_v61 }
 0x17f   : > { %1221 = vmatpush1.bf16.msra.mxu1 %v1220_v22 }
 0x180   : > { %1222 = vmatprep.subr.bf16.mxu1 %v1370_v61 }
 0x183   : > { %1224 = vmatpush1.bf16.msra.mxu1 %v1223_v25 }
 0x184   : > { %1225 = vmatprep.subr.bf16.mxu1 %v1370_v61  ;;  %v834_v61 = vld [vmem:[%s2094_s4] sm:$0xff] }
 0x187   : > { %1228 = vmatpush1.bf16.msk.msra.mxu1 %vm1227_vm6, %v1226_v28 }
 0x239   : > { %v823_v29 = vpop.f32.mrb[0].mxu1 }
 0x23a   : > { %v825_v30 = vpop.f32.mrb[1].mxu1  ;;  %v838_v36 = vmul.f32 %v834_v61, %v823_v29 }
 0x23b   : > { %v839_v34 = vmul.f32 %v835_v31, %v825_v30 }
 0x23d   : > { %v829_v35 = vpop.f32.mrb[2].mxu1  ;;  %v850_v41 = vsel %vm849_vm7, %v839_v34, 0.0 }
 0x23e   : > { %v840_v37 = vmul.f32 %v836_v32, %v829_v35  ;;  %v831_v38 = vpop.f32.mrb[3].mxu1 }
 0x23f   : > { %v841_v39 = vmul.f32 %v837_v33, %v831_v38 }
 0x240   : > { %v842_v40 = vadd.f32 %v840_v37, %v838_v36 }
 0x241   : > { %v851_v42 = vsel %vm849_vm7, %v841_v39, 0.0 }
 0x242   : > { %v843_v43 = vrot.slane %v842_v40, 4  ;;  %v852_v44 = vadd.f32 %v851_v42, %v850_v41 }
 0x244   : > { %v844_v45 = vadd.f32 %v843_v43, %v842_v40  ;;  %v853_v46 = vrot.slane %v852_v44, 4 }
 0x246   : > { %v845_v47 = vrot.slane %v844_v45, 2  ;;  %v854_v48 = vadd.f32 %v853_v46, %v852_v44 }
 0x248   : > { %v846_v49 = vadd.f32 %v845_v47, %v844_v45  ;;  %v855_v50 = vrot.slane %v854_v48, 2 }
 0x24a   : > { %v856_v51 = vadd.f32 %v855_v50, %v854_v48  ;;  %v847_v52 = vrot.slane %v846_v49, 1 }
 0x24c   : > { %v857_v53 = vrot.slane %v856_v51, 1  ;;  %v848_v55 = vadd.f32 %v847_v52, %v846_v49 }
 0x24e   : > { %v858_v54 = vadd.f32 %v857_v53, %v856_v51 }
 0x250   : > { %1043 = vmatprep.mubr.msk.f32.mxu1 %vm849_vm7, %v858_v54 }
 0x251   : > { %950 = vmatmul.mubr.f32.vlgmr.msra.gmra.mrb[4].mxu1 %v848_v55 }
 0x324   : > { %v951_v57 = vpop.f32.mrb[4].mxu1 }
 0x325   : > { %v952_v58 = vadd.f32 %v951_v57, %v877_v56  ;;  %v953_v59 = vpop.f32.mrb[5].mxu1 }
 0x327   : > { %956 = vst.msk [vmem:[%s270_s23] sm:$0x1] %vm955_vm8, %v952_v58 }
 0x328   : > { %1317 = shalt.err (!%p1314_p3)
}
 0x329   : > { %s1318_s18 = scalar_lea.hbm %s2048_s21, 16  ;;  %s1322_s16 = scalar_lea.hbm %s2097_s7, 32 }
 0x32a   : > { %p1319_p4 = scmp.ne.s32.totalorder %s2048_s21, %s1318_s18  ;;  %p1323_p9 = scmp.lt.u32.totalorder %s2048_s21, %s2097_s7 }
 0x32b   : > { %p1324_p10 = scmp.lt.u32.totalorder %s1322_s16, %s1318_s18  ;;  %p1326_p12 = scmp.lt.u32.totalorder %s1318_s18, %s2048_s21 }
 0x32c   : > { %p1320_p7 = pnand %p1319_p4, %p1450_p5 }
 0x32d   : > { %p1325_p11 = por %p1324_p10, %p1323_p9 }
 0x32e   : > { %p1321_p8 = pneg %p1320_p7 }
 0x32f   : > { %p1327_p13 = por %p1326_p12, %p1325_p11 }
 0x331   : > { %p1328_p0 = pnand %p1327_p13, %p1321_p8 }
 0x333   : > { %1331 = shalt.err (!%p1328_p0)
}
 0x334   : > { %1262 = dma.vmem_to_hbm [thread:$0]  (%p1450_p5), %s2050_s29, 16, %s2048_s21, %s958_s9  }
 0x335 PF: > { %p1268_p1 = scmp.ge.s32.totalorder %s1366_s27, 2  ;;  %s982_s13 = sand.u32 1, %s1354_s24  }
 0x336   : > { %s983_s8 = scalar_lea.sflag [#allocation3], %s982_s13 }
 0x337   : > { %p1265_p2 = pnand %p1268_p1, %p1454_p6 }
 0x339   : > { %1349 = dma.done.wait (!%p1265_p2), %s983_s8, 16  }
 0x33a   : > { %1351 = vsyncadd (!%p1265_p2), %s983_s8, 4294967280  ;;  %p17_p3 = scmp.ge.s32.totalorder %s1437_s30, 4   ;;  %s2100_s24 = smov %s1358_s25 }
 0x33b   : > { %s2101_s25 = smov %s1362_s26  ;;  %s2102_s26 = smov %s1448_s10 }
 0x33c   : > { %s2103_s27 = smov %s1437_s30  ;;  %19 = sbr.rel (!%p17_p3) target bundleno = 3 (0x3), region = 83 }
 0x343   :  { %987 = vsyncpa [#allocation3], 1 }
 0x344   :  { %989 = vsyncpa [#allocation3 + $0x1], 1 }

</bundles_post_ra>
